<compile_context>
chip_gen: v5e
topology: v5e:2x2
jax: 0.10.0
libtpu: 0.0.40
codegen_flags: <defaults>
</compile_context>

<pallas_src>
import jax
import jax.numpy as jnp
import numpy as np
from jax.experimental import pallas as pl
from jax.experimental.pallas import tpu as pltpu


def _linproj_kernel(x_ref, w_ref, b_ref, q_ref, k_ref, v_ref):
    """One row tile: (tm, dim) @ (dim, 3*inner) -> three (tm, inner) slabs."""
    inner = q_ref.shape[-1]
    acc = jnp.dot(x_ref[...], w_ref[...], preferred_element_type=jnp.float32)
    acc = acc + b_ref[...]                       # f32 bias add on the accumulator
    q_ref[...] = acc[:, :inner].astype(q_ref.dtype)
    k_ref[...] = acc[:, inner:2 * inner].astype(k_ref.dtype)
    v_ref[...] = acc[:, 2 * inner:].astype(v_ref.dtype)


def linear_projection_pallas_flat(x, wq, bq, wkv, bkv, *,
                                  block_rows=512,
                                  operand_dtype=jnp.bfloat16,
                                  out_dtype=None):
    """Fused q/kv projection.

    Returns (q, k, v) as lane-dense (B*N, inner_dim) slabs -- the recommended
    interface for a downstream attention kernel (pick head h via a column
    BlockSpec at h*head_dim).  Weights are (in_features, out_features), i.e.
    PyTorch `linear.weight.T`; biases are (out_features,).
    """
    # TODO(synk): cross-attention path (attn_kv is not None) would reuse this
    # kernel on the attn_kv rows for the kv half only; not wired here.
    B, N, dim = x.shape
    inner = wq.shape[1]
    assert wkv.shape[1] == 2 * inner, "Wkv must have 2*inner_dim columns"
    assert inner % 128 == 0, "inner_dim must be a multiple of 128 for lane-dense stores"
    M = B * N
    out_dtype = out_dtype or x.dtype

    op_bytes = jnp.dtype(operand_dtype).itemsize
    out_bytes = jnp.dtype(out_dtype).itemsize

    # One-time weight/bias prep outside the kernel (fused single matmul).
    w_cat = jnp.concatenate([wq, wkv], axis=1).astype(operand_dtype)     # (dim, 3*inner)
    b_cat = jnp.concatenate(
        [bq.reshape(1, -1), bkv.reshape(1, -1)], axis=1).astype(jnp.float32)  # (1, 3*inner)
    x_flat = x.reshape(M, dim).astype(operand_dtype)

    # Row tile: multiple of 16 for bf16 (2 rows/sublane), 8 for f32.  No pad of
    # x -- the ragged last block is masked by Pallas on store.
    row_align = 16 if op_bytes == 2 else 8
    tm = min(block_rows, M)
    tm = max(row_align, (tm // row_align) * row_align)
    grid = (pl.cdiv(M, tm),)

    # VMEM budget from the actual footprint (double-buffered tiles + resident
    # fused weights).  TODO(synk): if bf16 Wcat alone overflows ~40 MiB on
    # v7x (64 MiB/TC), add an innermost output-column grid axis and stream
    # weight column blocks instead of keeping them fully resident.
    footprint = (2 * tm * dim * op_bytes                 # x tile (double buffered)
                 + 2 * dim * 3 * inner * op_bytes        # resident Wcat
                 + 2 * 3 * inner * 4                     # resident bias (f32)
                 + 2 * 3 * tm * inner * out_bytes        # q/k/v out tiles
                 + tm * 3 * inner * 4)                   # f32 accumulator slack
    vmem_limit = int(footprint * 1.5) + (2 << 20)
    vmem_limit = max(vmem_limit, 32 << 20)
    vmem_limit = min(vmem_limit, 64 << 20)               # stay under v7x per-TC VMEM

    q_flat, k_flat, v_flat = pl.pallas_call(
        _linproj_kernel,
        out_shape=(
            jax.ShapeDtypeStruct((M, inner), out_dtype),
            jax.ShapeDtypeStruct((M, inner), out_dtype),
            jax.ShapeDtypeStruct((M, inner), out_dtype),
        ),
        grid_spec=pltpu.PrefetchScalarGridSpec(
            num_scalar_prefetch=0,
            grid=grid,
            in_specs=[
                pl.BlockSpec((tm, dim), lambda i: (i, 0)),             # x rows
                pl.BlockSpec((dim, 3 * inner), lambda i: (0, 0)),      # Wcat (resident)
                pl.BlockSpec((1, 3 * inner), lambda i: (0, 0)),        # bcat (resident)
            ],
            out_specs=[
                pl.BlockSpec((tm, inner), lambda i: (i, 0)),           # q slab
                pl.BlockSpec((tm, inner), lambda i: (i, 0)),           # k slab
                pl.BlockSpec((tm, inner), lambda i: (i, 0)),           # v slab
            ],
        ),
        compiler_params=pltpu.CompilerParams(
            dimension_semantics=("parallel",),
            vmem_limit_bytes=vmem_limit),
    )(x_flat, w_cat, b_cat)
    return q_flat, k_flat, v_flat


def linear_projection_pallas(x, wq, bq, wkv, bkv, *, heads, **kwargs):
    """Module-compatible API: returns (q, k, v) each (B, heads, N, head_dim).

    The head split / permute below is pure layout plumbing done by XLA; when
    chaining into an attention Pallas kernel, use `linear_projection_pallas_flat`
    and index heads via the attention kernel's BlockSpec instead.
    """
    B, N, _ = x.shape
    inner = wq.shape[1]
    head_dim = inner // heads
    q_f, k_f, v_f = linear_projection_pallas_flat(x, wq, bq, wkv, bkv, **kwargs)

    def to_heads(t):
        return t.reshape(B, N, heads, head_dim).transpose(0, 2, 1, 3)

    return to_heads(q_f), to_heads(k_f), to_heads(v_f)


def linear_projection_ref(x, wq, bq, wkv, bkv, *, heads):
    """Pure-JAX f32 reference matching the PyTorch module's forward."""
    B, N, _ = x.shape
    inner = wq.shape[1]
    head_dim = inner // heads
    q = jnp.einsum("bnd,dh->bnh", x, wq) + bq.reshape(1, 1, -1)
    kv = jnp.einsum("bnd,dh->bnh", x, wkv) + bkv.reshape(1, 1, -1)
    q = q.reshape(B, N, heads, head_dim).transpose(0, 2, 1, 3)
    kv = kv.reshape(B, N, 2, heads, head_dim).transpose(2, 0, 3, 1, 4)
    return q, kv[0], kv[1]


if __name__ == "__main__":
    # LinearProjection(dim=32, heads=4, dim_head=32) on x of shape (2, 16, 32).
    B, N, dim = 2, 16, 32
    heads, head_dim = 4, 32
    inner_dim = heads * head_dim            # 128 -> lane-dense output slabs

    key = jax.random.PRNGKey(0)
    kx, kw1, kb1, kw2, kb2 = jax.random.split(key, 5)
    x = jax.random.normal(kx, (B, N, dim), dtype=jnp.float32)
    wq = jax.random.normal(kw1, (dim, inner_dim), dtype=jnp.float32) * 0.05
    bq = jax.random.normal(kb1, (inner_dim,), dtype=jnp.float32) * 0.05
    wkv = jax.random.normal(kw2, (dim, 2 * inner_dim), dtype=jnp.float32) * 0.05
    bkv = jax.random.normal(kb2, (2 * inner_dim,), dtype=jnp.float32) * 0.05

    # block_rows=16 -> 2-step row grid at toy sizes (exercises pipelining and
    # megacore sharding); production shapes should use the 512-row default
    # (256-384 on v7x).
    q, k, v = linear_projection_pallas(x, wq, bq, wkv, bkv,
                                       heads=heads, block_rows=16)
    jax.block_until_ready((q, k, v))

    q_r, k_r, v_r = linear_projection_ref(x, wq, bq, wkv, bkv, heads=heads)
    # bf16 operands (f32 accumulation) vs f32 reference -> loose-but-tight-enough tolerance.
    np.testing.assert_allclose(np.asarray(q), np.asarray(q_r), rtol=2e-2, atol=2e-2)
    np.testing.assert_allclose(np.asarray(k), np.asarray(k_r), rtol=2e-2, atol=2e-2)
    np.testing.assert_allclose(np.asarray(v), np.asarray(v_r), rtol=2e-2, atol=2e-2)

    # Ragged-M check (M=24 not divisible by tm=16): exercises the no-pad path
    # where Pallas masks the partial last row block on store.
    x2 = jax.random.normal(jax.random.PRNGKey(1), (2, 12, dim), dtype=jnp.float32)
    q2, k2, v2 = linear_projection_pallas(x2, wq, bq, wkv, bkv,
                                          heads=heads, block_rows=16)
    jax.block_until_ready((q2, k2, v2))
    q2r, k2r, v2r = linear_projection_ref(x2, wq, bq, wkv, bkv, heads=heads)
    np.testing.assert_allclose(np.asarray(q2), np.asarray(q2r), rtol=2e-2, atol=2e-2)
    np.testing.assert_allclose(np.asarray(k2), np.asarray(k2r), rtol=2e-2, atol=2e-2)
    np.testing.assert_allclose(np.asarray(v2), np.asarray(v2r), rtol=2e-2, atol=2e-2)

    print("KERNEL_OK")
</pallas_src>

<mosaic_0001>
module attributes {stable_mosaic.version = 11 : i64} {
  func.func @_linproj_kernel(%arg0: i32, %arg1: memref<16x32xbf16, #tpu.memory_space<vmem>>, %arg2: memref<32x384xbf16, #tpu.memory_space<vmem>>, %arg3: memref<1x384xf32, #tpu.memory_space<vmem>>, %arg4: memref<16x128xf32, #tpu.memory_space<vmem>>, %arg5: memref<16x128xf32, #tpu.memory_space<vmem>>, %arg6: memref<16x128xf32, #tpu.memory_space<vmem>>) attributes {dimension_semantics = [#tpu.dimension_semantics<parallel>], iteration_bounds = array<i64: 2>, scalar_prefetch = 0 : i64, scratch_operands = 0 : i64, tpu.core_type = #tpu.core_type<tc>, window_params = [{transform_indices = @transform_0, window_bounds = array<i64: 16, 32>}, {pipeline_mode = #tpu.pipeline_mode<synchronous>, transform_indices = @transform_1, window_bounds = array<i64: 32, 384>}, {pipeline_mode = #tpu.pipeline_mode<synchronous>, transform_indices = @transform_2, window_bounds = array<i64: 1, 384>}, {transform_indices = @transform_3, window_bounds = array<i64: 16, 128>}, {transform_indices = @transform_4, window_bounds = array<i64: 16, 128>}, {transform_indices = @transform_5, window_bounds = array<i64: 16, 128>}]} {
    %c0 = arith.constant 0 : index
    %c0_0 = arith.constant 0 : index
    %0 = vector.load %arg1[%c0, %c0_0] : memref<16x32xbf16, #tpu.memory_space<vmem>>, vector<16x32xbf16>
    %c0_1 = arith.constant 0 : index
    %c0_2 = arith.constant 0 : index
    %1 = vector.load %arg2[%c0_1, %c0_2] : memref<32x384xbf16, #tpu.memory_space<vmem>>, vector<32x384xbf16>
    %cst = arith.constant dense<0.000000e+00> : vector<16x384xf32>
    %2 = tpu.matmul %0, %1, %cst {dimension_numbers = #tpu.dot_dimension_numbers<[1], [0], [0], [1], [0, 0, 1, 1], [], []>} : vector<16x32xbf16>, vector<32x384xbf16>, vector<16x384xf32> -> vector<16x384xf32>
    %c0_3 = arith.constant 0 : index
    %c0_4 = arith.constant 0 : index
    %3 = vector.load %arg3[%c0_3, %c0_4] : memref<1x384xf32, #tpu.memory_space<vmem>>, vector<1x384xf32>
    %4 = vector.broadcast %3 : vector<1x384xf32> to vector<16x384xf32>
    %5 = arith.addf %2, %4 : vector<16x384xf32>
    %6 = vector.extract_strided_slice %5 {offsets = [0, 0], sizes = [16, 128], strides = [1, 1]} : vector<16x384xf32> to vector<16x128xf32>
    %c0_5 = arith.constant 0 : index
    %c0_6 = arith.constant 0 : index
    %7 = vector.load %arg4[%c0_5, %c0_6] : memref<16x128xf32, #tpu.memory_space<vmem>>, vector<16x128xf32>
    tpu.vector_store %arg4[%c0_5, %c0_6], %6 {strides = array<i32>} : memref<16x128xf32, #tpu.memory_space<vmem>>, vector<16x128xf32>,
    %8 = vector.extract_strided_slice %5 {offsets = [0, 128], sizes = [16, 128], strides = [1, 1]} : vector<16x384xf32> to vector<16x128xf32>
    %c0_7 = arith.constant 0 : index
    %c0_8 = arith.constant 0 : index
    %9 = vector.load %arg5[%c0_7, %c0_8] : memref<16x128xf32, #tpu.memory_space<vmem>>, vector<16x128xf32>
    tpu.vector_store %arg5[%c0_7, %c0_8], %8 {strides = array<i32>} : memref<16x128xf32, #tpu.memory_space<vmem>>, vector<16x128xf32>,
    %10 = vector.extract_strided_slice %5 {offsets = [0, 256], sizes = [16, 128], strides = [1, 1]} : vector<16x384xf32> to vector<16x128xf32>
    %c0_9 = arith.constant 0 : index
    %c0_10 = arith.constant 0 : index
    %11 = vector.load %arg6[%c0_9, %c0_10] : memref<16x128xf32, #tpu.memory_space<vmem>>, vector<16x128xf32>
    tpu.vector_store %arg6[%c0_9, %c0_10], %10 {strides = array<i32>} : memref<16x128xf32, #tpu.memory_space<vmem>>, vector<16x128xf32>,
    return
  }
  func.func @transform_0(%arg0: i32) -> (i32, i32) {
    %c0_i32 = arith.constant 0 : i32
    %c0_i32_0 = arith.constant 0 : i32
    return %arg0, %c0_i32 : i32, i32
  }
  func.func @transform_1(%arg0: i32) -> (i32, i32) {
    %c0_i32 = arith.constant 0 : i32
    %c0_i32_0 = arith.constant 0 : i32
    %c0_i32_1 = arith.constant 0 : i32
    return %c0_i32, %c0_i32_0 : i32, i32
  }
  func.func @transform_2(%arg0: i32) -> (i32, i32) {
    %c0_i32 = arith.constant 0 : i32
    %c0_i32_0 = arith.constant 0 : i32
    %c0_i32_1 = arith.constant 0 : i32
    return %c0_i32, %c0_i32_0 : i32, i32
  }
  func.func @transform_3(%arg0: i32) -> (i32, i32) {
    %c0_i32 = arith.constant 0 : i32
    %c0_i32_0 = arith.constant 0 : i32
    return %arg0, %c0_i32 : i32, i32
  }
  func.func @transform_4(%arg0: i32) -> (i32, i32) {
    %c0_i32 = arith.constant 0 : i32
    %c0_i32_0 = arith.constant 0 : i32
    return %arg0, %c0_i32 : i32, i32
  }
  func.func @transform_5(%arg0: i32) -> (i32, i32) {
    %c0_i32 = arith.constant 0 : i32
    %c0_i32_0 = arith.constant 0 : i32
    return %arg0, %c0_i32 : i32, i32
  }
}

</mosaic_0001>

<bundles_post_ra>
// kernel: tpu_custom_call.1
= control target key start
LH: loop header
LB: loop body
LE: loop exit
PB: predicated region body
PF: predicated region fallthrough
CT: control target
= control target key end

     0   :  { %s1254_s0 = inlined_call_operand.hbm [shape: bf16[32,32], index: 0, kind: input, shape index: {}]   ;;  %s1255_s1 = inlined_call_operand.hbm [shape: bf16[32,384], index: 1, kind: input, shape index: {}]   ;;  %s1256_s2 = inlined_call_operand.hbm [shape: f32[1,384], index: 2, kind: input, shape index: {}]   ;;  %s1257_s3 = inlined_call_operand.hbm [shape: f32[32,128], index: 3, kind: output, shape index: {0}]   ;;  %s1258_s4 = inlined_call_operand.hbm [shape: f32[32,128], index: 4, kind: output, shape index: {1}]   ;;  %s1259_s5 = inlined_call_operand.hbm [shape: f32[32,128], index: 5, kind: output, shape index: {2}]  }
   0x1   :  { %1261 = sst [smem:[#allocation16_spill]] %s1254_s0 }
   0x2   :  { %1262 = sst [smem:[#allocation17_spill]] %s1255_s1 }
   0x3   :  { %11 = vsyncpa [#allocation3], 0 }
   0x4   :  { %13 = vsyncpa [#allocation3 + $0x1], 0 }
   0x5   :  { %14 = vsyncpa [#allocation6], 0 }
   0x6   :  { %15 = vsyncpa [#allocation4], 0 }
   0x7   :  { %17 = vsyncpa [#allocation4 + $0x1], 0 }
   0x8   :  { %18 = vsyncpa [#allocation10], 0 }
   0x9   :  { %20 = vsyncpa [#allocation10 + $0x1], 0  ;;  %s1032_s18 = smov 0   ;;  %s1034_s19 = smov 0  }
   0xa   :  { %s1036_s20 = smov 0   ;;  %s1038_s21 = smov 0  }
   0xb LB: > { %s1053_s22 = sadd.s32 4294967295, %s992_s21   ;;  %s1260_s23 = sadd.s32 4294967294, %s992_s21   ;;  %s992_s21 = sphi %s1038_s21, %s1275_s21   ;;  %s988_s20 = sphi %s1036_s20, %s1274_s20   ;;  %s984_s19 = sphi %s1034_s19, %s1273_s19   ;;  %s980_s18 = sphi %s1032_s18, %s1272_s18  }
   0xc   : > { %p46_p0 = scmp.ne.s32.totalorder %s984_s19, %s980_s18  ;;  %p47_p1 = scmp.eq.s32.totalorder %s1053_s22, 0 }
   0xd   : > { %p112_p2 = scmp.eq.s32.totalorder %s1053_s22, 1  ;;  %p118_p3 = scmp.eq.s32.totalorder %s1260_s23, 1 }
   0xe   : > { %p1064_p4 = por %p47_p1, %p46_p0  ;;  %p622_p5 = scmp.ge.s32.totalorder %s992_s21, 1 }
   0xf   : > { %p1069_p6 = por %p118_p3, %p46_p0  ;;  %p177_p7 = scmp.lt.s32.totalorder %s992_s21, 3 }
  0x10   : > { %s1265_s1 = sld [smem:[#allocation17_spill]]  ;;  %s994_s30 = smov [#allocation5]  }
  0x11   : > { %p1077_p8 = pnand %p622_p5, %p177_p7  ;;  %s190_s6 = sshll.u32 %s994_s30, 4  ;;  %s191_s6 = int_to_ptr.vmem [resolvable:$true] %s190_s6 }
  0x12   : > { %s203_s9 = sshll.u32 %s1256_s2, 4  ;;  %s995_s10 = smov 192   ;;  %s204_s9 = int_to_ptr.hbm [resolvable:$true] %s203_s9 }
  0x13   : > { %p705_p9 = pneg %p1077_p8  ;;  %s996_s11 = smov 12  }
  0x14   : > { %s997_s12 = smov [#allocation7]   ;;  %s1090_s14 = sadd.s32 1, %s992_s21  }
  0x15   : > { %p706_p10 = pnand %p705_p9, %p47_p1  ;;  %s205_s13 = sshll.u32 %s997_s12, 4  ;;  %s206_s13 = int_to_ptr.vmem [resolvable:$true] %s205_s13 }
  0x16   : > { %s188_s28 = sshll.u32 %s1265_s1, 4  ;;  %s33_s15 = sadd.s32 1, %s988_s20  ;;  %s189_s28 = int_to_ptr.hbm [resolvable:$true] %s188_s28 }
  0x17   : > { %708 = dma.hbm_to_vmem [thread:$0]  (!%p706_p10), %s189_s28, 768, %s191_s6, [#allocation6], %s995_s10, %s995_s10, %s996_s11  }
  0x18   : > { %711 = dma.hbm_to_vmem [thread:$0]  (!%p706_p10), %s204_s9, 48, %s206_s13, [#allocation6]  }
  0x19   : > { %s30_s16 = ssub.s32 %s992_s21, %s1090_s14  ;;  %p40_p12 = scmp.ne.s32.totalorder %s988_s20, %s984_s19 }
  0x1a   : > { %p31_p13 = scmp.eq.s32.totalorder %s30_s16, 0  ;;  %p41_p0 = scmp.eq.s32.totalorder %s992_s21, 0 }
  0x1b   : > { %p1100_p3 = por %p112_p2, %p40_p12  ;;  %p728_p5 = scmp.lt.s32.totalorder %s992_s21, 2 }
  0x1c   : > { %s1106_s26 = scalar_select %p31_p13, %s988_s20, %s33_s15  }
  0x1d   : > { %p42_p7 = por %p41_p0, %p40_p12  ;;  %s216_s27 = sand.u32 1, %s988_s20  }
  0x1e   : > { %s626_s28 = sshll.u32 %s216_s27, 3  ;;  %s678_s30 = sshll.u32 %s992_s21, 3 }
  0x1f   : > { %s1268_s0 = sld [smem:[#allocation16_spill]]  ;;  %s220_s9 = scalar_lea.vmem [#allocation2], %s626_s28 }
  0x20   : > { %s228_s10 = sshll.u32 %s220_s9, 4  ;;  %p1113_p2 = pnand %p728_p5, %p42_p7  ;;  %s229_s10 = int_to_ptr.vmem [resolvable:$true] %s228_s10 }
  0x21   : > { %s217_s13 = scalar_lea.sflag [#allocation3], %s216_s27 }
  0x22   : > { %p836_p10 = pneg %p1113_p2 }
  0x25   : > { %s225_s8 = scalar_lea.hbm %s1268_s0, %s678_s30  ;;  %s839_s6 = scalar_lea.hbm %s1268_s0, 16 }
  0x26   : > { %s226_s11 = sshll.u32 %s225_s8, 4  ;;  %s227_s11 = int_to_ptr.hbm [resolvable:$true] %s226_s11 }
  0x27   : > { %s832_s15 = sshra.s32 %s227_s11, 4  ;;  %s833_s15 = int_to_ptr.hbm [resolvable:$true] %s832_s15 }
  0x28   : > { %s834_s16 = scalar_lea.hbm %s833_s15, 8  ;;  %p840_p0 = scmp.lt.s32.totalorder %s833_s15, %s1268_s0 }
  0x29   : > { %p835_p9 = scmp.ne.s32.totalorder %s833_s15, %s834_s16  ;;  %p841_p5 = scmp.lt.s32.totalorder %s839_s6, %s834_s16 }
  0x2b   : > { %p837_p12 = pnand %p836_p10, %p835_p9  ;;  %p842_p7 = por %p841_p5, %p840_p0 }
  0x2d   : > { %p838_p13 = pneg %p837_p12 }
  0x2f   : > { %p843_p11 = pnand %p842_p7, %p838_p13 }
  0x31   : > { %846 = shalt.err (!%p843_p11)
}
  0x32   : > { %s998_s27 = smov 64   ;;  %s999_s9 = smov 4  }
  0x33   : > { %715 = dma.hbm_to_vmem [thread:$0]  (!%p1113_p2), %s227_s11, 128, %s229_s10, %s217_s13, %s998_s27, %s998_s27, %s999_s9  }
  0x34   : > { %240 = sbr.rel (%p1077_p8) target bundleno = 236 (0xec), region = 32  ;;  %s1130_s30 = sand.u32 (!%p1077_p8), 1, %s984_s19  }
  0x35   : > { %s630_s28 = sshll.u32 (!%p1077_p8), %s1130_s30, 3  ;;  %s243_s15 = scalar_lea.sflag (!%p1077_p8), [#allocation3], %s1130_s30 }
  0x36   : > { %s246_s16 = scalar_lea.vmem (!%p1077_p8), [#allocation2], %s630_s28 }
  0x39   : > { %963 = dma.done.wait (%p1064_p4), %s243_s15, 128  }
  0x3a   : > { %965 = vsyncadd (%p1064_p4), %s243_s15, 4294967168 }
  0x3b   : > { %967 = dma.done.wait (%p47_p1), [#allocation6], 816  }
  0x3c   : > { %969 = vsyncadd (%p47_p1), [#allocation6], 4294966480  ;;  %v654_v0 = vld [vmem:[#allocation5 + $0x18] sm:$0xf]  ;;  %v684_v1 = vld [vmem:[#allocation5 + $0x20] sm:$0xf0] }
  0x3d   : > { %v683_v2 = vld [vmem:[#allocation5 + $0x1c] sm:$0xf]  ;;  %v655_v3 = vor.u32 %v684_v1, %v654_v0  ;;  %v656_v4 = vld [vmem:[#allocation5 + $0x24] sm:$0xf0]  ;;  %v662_v5 = vld [vmem:[#allocation5 + $0x20] sm:$0xf] }
  0x3e   : > { %v685_v6 = vld [vmem:[#allocation5 + $0x28] sm:$0xf0]  ;;  %v659_v7 = vor.u32 %v683_v2, %v656_v4  ;;  %v642_v9 = vld [vmem:[#allocation5] sm:$0xf]  ;;  %v680_v11 = vld [vmem:[#allocation5 + $0x4] sm:$0xf] }
  0x3f   : > { %v663_v8 = vor.u32 %v685_v6, %v662_v5  ;;  %v681_v10 = vld [vmem:[#allocation5 + $0x8] sm:$0xf0]  ;;  %364 = vmatpush.bf16.msra.mxu0 %v655_v3  ;;  %v644_v13 = vld [vmem:[#allocation5 + $0xc] sm:$0xf0]  ;;  %v650_v14 = vld [vmem:[#allocation5 + $0x8] sm:$0xf] }
  0x40   : > { %v643_v12 = vor.u32 %v681_v10, %v642_v9  ;;  %v682_v15 = vld [vmem:[#allocation5 + $0x10] sm:$0xf0]  ;;  %378 = vmatpush.bf16.msra.mxu1 %v659_v7  ;;  %v647_v16 = vor.u32 %v680_v11, %v644_v13  ;;  %vm354_vm0 = vcmask 261120   ;;  %v1142_v19 = vld [vmem:[#allocation7] sm:$0x7]  ;;  %s633_s24 = sshll.u32 %s1130_s30, 4 }
  0x41   : > { %392 = vmatpush.bf16.msra.mxu2 %v663_v8  ;;  %v651_v17 = vor.u32 %v682_v15, %v650_v14  ;;  %v679_v18 = vld [vmem:[%s246_s16] sm:$0xff]  ;;  %v311_v20 = vperm.slane %v1142_v19, 0  ;;  %v312_v21 = vperm.slane %v1142_v19, 1  ;;  %s1148_s29 = sshll.u32 %s1053_s22, 4  ;;  %s279_s10 = scalar_lea.vmem [#allocation8], %s633_s24  ;;  %v313_v26 = vperm.slane %v1142_v19, 2 }
  0x42   : > { %s429_s11 = sshll.u32 %s279_s10, 4  ;;  %s286_s12 = scalar_lea.vmem [#allocation9], %s633_s24  ;;  %s1160_s11 = int_to_ptr.vmem [resolvable:$true] %s429_s11 }
  0x43   : > { %365 = vmatpush.bf16.msra.mxu0 %v643_v12  ;;  %s446_s13 = sshll.u32 %s286_s12, 4  ;;  %s445_s8 = scalar_lea.hbm %s1258_s4, %s1148_s29  ;;  %s1162_s13 = int_to_ptr.vmem [resolvable:$true] %s446_s13 }
  0x44   : > { %379 = vmatpush.bf16.msra.mxu1 %v647_v16  ;;  %s411_s27 = sand.u32 1, %s1053_s22   ;;  %s428_s15 = scalar_lea.hbm %s1257_s3, %s1148_s29 }
  0x45   : > { %393 = vmatpush.bf16.msra.mxu2 %v651_v17  ;;  %s1164_s16 = sshll.u32 %s445_s8, 4  ;;  %s1166_s23 = sshll.u32 %s428_s15, 4  ;;  %s449_s16 = int_to_ptr.hbm [resolvable:$true] %s1164_s16  ;;  %s432_s23 = int_to_ptr.hbm [resolvable:$true] %s1166_s23 }
  0x46   : > { %664 = vmatmul.msk.bf16.vlgmr.msra.gmra.mxu0 %vm354_vm0, %v679_v18  ;;  %s462_s7 = scalar_lea.hbm %s1259_s5, %s1148_s29  ;;  %s1172_s9 = scalar_lea.vmem [#allocation11], %s633_s24 }
  0x47   : > { %665 = vmatmul.msk.bf16.vlgmr.msra.gmra.mxu1 %vm354_vm0, %v679_v18  ;;  %s463_s8 = sshll.u32 %s1172_s9, 4  ;;  %s1178_s28 = sshll.u32 %s462_s7, 4  ;;  %s464_s8 = int_to_ptr.vmem [resolvable:$true] %s463_s8  ;;  %s466_s28 = int_to_ptr.hbm [resolvable:$true] %s1178_s28 }
  0x48   : > { %666 = vmatmul.msk.bf16.vlgmr.msra.gmra.mxu2 %vm354_vm0, %v679_v18  ;;  %s1180_s15 = scalar_lea.sflag [#allocation10], %s411_s27  ;;  %s876_s0 = sshra.s32 %s449_s16, 4  ;;  %s877_s0 = int_to_ptr.hbm [resolvable:$true] %s876_s0 }
  0x49   : > { %s878_s22 = scalar_lea.hbm %s877_s0, 16  ;;  %s882_s6 = scalar_lea.hbm %s1258_s4, 32 }
  0x4a   : > { %p879_p1 = scmp.ne.s32.totalorder %s877_s0, %s878_s22  ;;  %p883_p11 = scmp.lt.s32.totalorder %s877_s0, %s1258_s4 }
  0x4b   : > { %p884_p2 = scmp.lt.s32.totalorder %s882_s6, %s878_s22 }
  0x4c   : > { %p880_p4 = pnand %p879_p1, %p1100_p3 }
  0x4d   : > { %p885_p9 = por %p884_p2, %p883_p11 }
  0x4e   : > { %p881_p8 = pneg %p880_p4 }
  0x50   : > { %p886_p10 = pnand %p885_p9, %p881_p8 }
  0xc3   : > { %v367_v22 = vpop.f32.mrf.mxu0 }
  0xc4   : > { %v368_v23 = vadd.f32 %v367_v22, %v311_v20  ;;  %v381_v24 = vpop.f32.mrf.mxu1 }
  0xc5   : > { %v382_v25 = vadd.f32 %v381_v24, %v312_v21 }
  0xc6   : > { %400 = vst [vmem:[%s279_s10] sm:$0xff] %v368_v23 }
  0xc7   : > { %402 = vst [vmem:[%s286_s12] sm:$0xff] %v382_v25 }
  0xcb   : > { %v395_v27 = vpop.f32.mrf.mxu2  ;;  %v369_v29 = vpop.f32.mrf.mxu0 }
  0xcc   : > { %v396_v28 = vadd.f32 %v395_v27, %v313_v26  ;;  %v370_v30 = vadd.f32 %v369_v29, %v311_v20  ;;  %v383_v31 = vpop.f32.mrf.mxu1 }
  0xcd   : > { %v384_v32 = vadd.f32 %v383_v31, %v312_v21 }
  0xce   : > { %404 = vst [vmem:[%s1172_s9] sm:$0xff] %v396_v28 }
  0xcf   : > { %401 = vst [vmem:[%s279_s10 + $0x8] sm:$0xff] %v370_v30 }
  0xd0   : > { %403 = vst [vmem:[%s286_s12 + $0x8] sm:$0xff] %v384_v32 }
  0xd1   : > { %889 = shalt.err (!%p886_p10)
}
  0xd2   : > { %s1000_s12 = smov 128   ;;  %s1001_s27 = smov 8  }
  0xd3   : > { %700 = dma.vmem_to_hbm [thread:$0]  (%p1100_p3), %s1162_s13, 256, %s449_s16, %s1180_s15, %s1000_s12, %s1000_s12, %s1001_s27  }
  0xd4   : > { %s407_s7 = scalar_lea.sflag [#allocation4], %s1130_s30  ;;  %s904_s0 = sshra.s32 %s432_s23, 4  ;;  %s905_s0 = int_to_ptr.hbm [resolvable:$true] %s904_s0 }
  0xd5   : > { %s906_s1 = scalar_lea.hbm %s905_s0, 16  ;;  %s910_s29 = scalar_lea.hbm %s1257_s3, 32 }
  0xd6   : > { %p907_p12 = scmp.ne.s32.totalorder %s905_s0, %s906_s1  ;;  %p911_p5 = scmp.lt.s32.totalorder %s905_s0, %s1257_s3 }
  0xd7   : > { %p912_p7 = scmp.lt.s32.totalorder %s910_s29, %s906_s1 }
  0xd8   : > { %p908_p13 = pnand %p907_p12, %p1100_p3 }
  0xd9   : > { %p913_p1 = por %p912_p7, %p911_p5 }
  0xda   : > { %p909_p0 = pneg %p908_p13 }
  0xdc   : > { %p914_p4 = pnand %p913_p1, %p909_p0 }
  0xde   : > { %917 = shalt.err (!%p914_p4)
}
  0xdf   : > { %699 = dma.vmem_to_hbm [thread:$0]  (%p1100_p3), %s1160_s11, 256, %s432_s23, %s407_s7, %s1000_s12, %s1000_s12, %s1001_s27   ;;  %v397_v33 = vpop.f32.mrf.mxu2 }
  0xe0   : > { %v398_v34 = vadd.f32 %v397_v33, %v313_v26  ;;  %s932_s30 = sshra.s32 %s466_s28, 4  ;;  %s938_s1 = scalar_lea.hbm %s1259_s5, 32  ;;  %s933_s30 = int_to_ptr.hbm [resolvable:$true] %s932_s30 }
  0xe1   : > { %s934_s13 = scalar_lea.hbm %s933_s30, 16  ;;  %p939_p9 = scmp.lt.s32.totalorder %s933_s30, %s1259_s5 }
  0xe2   : > { %405 = vst [vmem:[%s1172_s9 + $0x8] sm:$0xff] %v398_v34  ;;  %p935_p8 = scmp.ne.s32.totalorder %s933_s30, %s934_s13  ;;  %p940_p10 = scmp.lt.s32.totalorder %s938_s1, %s934_s13 }
  0xe4   : > { %p936_p11 = pnand %p935_p8, %p1100_p3  ;;  %p941_p12 = por %p940_p10, %p939_p9 }
  0xe6   : > { %p937_p2 = pneg %p936_p11 }
  0xe8   : > { %p942_p13 = pnand %p941_p12, %p937_p2 }
  0xea   : > { %945 = shalt.err (!%p942_p13)
}
  0xeb   : > { %701 = dma.vmem_to_hbm [thread:$0]  (%p1100_p3), %s464_s8, 256, %s466_s28, %s1180_s15, %s1000_s12, %s1000_s12, %s1001_s27  }
  0xec PF: > { %s480_s23 = sand.u32 1, %s980_s18   ;;  %p1270_p0 = scmp.ge.s32.totalorder %s992_s21, 2 }
  0xed   : > { %s481_s11 = scalar_lea.sflag [#allocation4], %s480_s23 }
  0xee   : > { %p717_p5 = pnand %p1270_p0, %p1069_p6 }
  0xf0   : > { %p718_p7 = pneg %p717_p5 }
  0xf2   : > { %971 = dma.done.wait (%p718_p7), %s481_s11, 256  }
  0xf3   : > { %973 = vsyncadd (%p718_p7), %s481_s11, 4294967040  ;;  %s1271_s9 = sadd.s32 4294967294, %s992_s21  }
  0xf4   : > { %s490_s17 = sand.u32 1, %s1271_s9  }
  0xf5   : > { %s491_s7 = scalar_lea.sflag [#allocation10], %s490_s17 }
  0xf6   : > { %975 = dma.done.wait (%p718_p7), %s491_s7, 512  }
  0xf7   : > { %977 = vsyncadd (%p718_p7), %s491_s7, 4294966784  ;;  %p23_p3 = scmp.ge.s32.totalorder %s1090_s14, 4   ;;  %s1272_s18 = smov %s984_s19 }
  0xf8   : > { %s1273_s19 = smov %s988_s20  ;;  %s1274_s20 = smov %s1106_s26 }
  0xf9   : > { %s1275_s21 = smov %s1090_s14  ;;  %25 = sbr.rel (!%p23_p3) target bundleno = 11 (0xb), region = 117 }
  0xfe   :  { %507 = vsyncpa [#allocation3], 1 }
  0xff   :  { %509 = vsyncpa [#allocation3 + $0x1], 1 }
 0x100   :  { %510 = vsyncpa [#allocation6], 1 }
 0x101   :  { %511 = vsyncpa [#allocation4], 1 }
 0x102   :  { %513 = vsyncpa [#allocation4 + $0x1], 1 }
 0x103   :  { %514 = vsyncpa [#allocation10], 1 }
 0x104   :  { %516 = vsyncpa [#allocation10 + $0x1], 1 }

</bundles_post_ra>
